<compile_context>
chip_gen: v7x
topology: tpu7x:2x2x1
jax: 0.10.0
libtpu: 0.0.40
codegen_flags: <defaults>
</compile_context>

<pallas_src>
import jax
import jax.numpy as jnp
from jax.experimental import pallas as pl
from jax.experimental.pallas import tpu as pltpu


def _batchnorm_kernel(eps, seq_len):
    inv_nm1 = 1.0 / float(seq_len - 1)   # torch.std default: unbiased (ddof=1)

    def kernel(x_ref, a_ref, b_ref, o_ref):
        # x_ref tile: (TB, S, TF); reductions are per batch row along axis 1.
        x = x_ref[...].astype(jnp.float32)                        # (TB, S, TF)
        mean = jnp.mean(x, axis=1, keepdims=True)                 # (TB, 1, TF)
        diff = x - mean                                           # dies right after the reduce
        var = jnp.sum(diff * diff, axis=1, keepdims=True) * jnp.float32(inv_nm1)
        # Exact reciprocal on the reduced (TB,1,TF) vector only (keeps the
        # 1e-5 tolerance vs. the reference — no approx EUP reciprocal).
        inv = 1.0 / (jnp.sqrt(var) + jnp.float32(eps))            # (TB, 1, TF)
        a = a_ref[...].astype(jnp.float32)                        # (1, 1, TF)
        b = b_ref[...].astype(jnp.float32)                        # (1, 1, TF)
        scale = a * inv                                           # (TB, 1, TF)
        shift = b - scale * mean                                  # mean folded into the shift
        # Per-element path is a single mul + add; no full-tile diff reaches the store.
        o_ref[...] = (x * scale + shift).astype(o_ref.dtype)

    return kernel


def _choose_tiles(B, S, F, io_itemsize):
    """Pick (TB, TF) batch/feature tile sizes and the per-step working set.

    Accounting (per performance review):
      * per-step VMEM working set = 4 double-buffered I/O tiles at the input
        dtype (in x2 + out x2) PLUS ~2 full-tile f32 temporaries (the f32
        upcast and `diff`) — counted at 4 B regardless of the I/O dtype.
      * target >= 8 grid steps (>= 4 per TC on v7x) as long as the per-step
        f32 tile stays >= ~0.5 MiB; below that, per-step overhead costs more
        than the extra pipeline overlap buys.
    """
    TARGET_STEPS = 8
    MIN_TILE_F32 = 512 * 1024          # ~0.5 MiB; ~1 MiB tiles ~ 85% of HBM roofline
    BUDGET = 10 * 1024 * 1024          # per-step working-set budget (v7x-safe)

    tf_cands = [F]
    if F % 128 == 0:
        tf_cands = [tf for tf in range(128, F + 1, 128) if F % tf == 0]
    tb_cands = [tb for tb in range(1, B + 1) if B % tb == 0]

    def working_set(tb, tf):
        io = 4 * tb * S * tf * io_itemsize      # in x2 + out x2 pipeline buffers
        f32_tmp = 2 * tb * S * tf * 4           # f32 upcast + diff temporaries
        return io + f32_tmp

    fitting = []
    fallback = None                              # minimal working set, if nothing fits
    for tb in tb_cands:
        for tf in tf_cands:
            ws = working_set(tb, tf)
            steps = (B // tb) * (F // tf)
            tile_f32 = tb * S * tf * 4
            big_enough = tile_f32 >= MIN_TILE_F32 or (tb == B and tf == F)
            entry = (tb, tf, ws, steps, tile_f32, big_enough)
            if ws <= BUDGET:
                fitting.append(entry)
            if fallback is None or ws < fallback[2]:
                fallback = entry

    if fitting:
        tb, tf, ws, _, _, _ = max(
            fitting,
            key=lambda e: (min(e[3], TARGET_STEPS) if e[5] else 0, e[4]))
        return tb, tf, ws
    return fallback[0], fallback[1], fallback[2]


def batchnorm_pallas(x, a_2, b_2, eps=1e-6):
    """x: (B, S, F), float32 or bfloat16.  a_2, b_2: (F,)."""
    B, S, F = x.shape
    assert S >= 2, "unbiased std (ddof=1) needs at least 2 elements along dim 1"

    tb, tf, ws = _choose_tiles(B, S, F, jnp.dtype(x.dtype).itemsize)
    grid = (B // tb, pl.cdiv(F, tf))

    # vmem limit = 2x the measured per-step working set, clamped to [16, 32] MiB:
    # above v5e's 16 MiB scoped default, well inside v7x's 64 MiB physical VMEM.
    vmem_limit = int(min(32 * 1024 * 1024, max(16 * 1024 * 1024, 2 * ws)))

    a3d = a_2.reshape(1, 1, F)
    b3d = b_2.reshape(1, 1, F)

    return pl.pallas_call(
        _batchnorm_kernel(eps, S),
        out_shape=jax.ShapeDtypeStruct((B, S, F), x.dtype),
        grid_spec=pltpu.PrefetchScalarGridSpec(
            num_scalar_prefetch=0,
            grid=grid,
            in_specs=[
                pl.BlockSpec((tb, S, tf), lambda i, j: (i, 0, j)),
                pl.BlockSpec((1, 1, tf), lambda i, j: (0, 0, j)),
                pl.BlockSpec((1, 1, tf), lambda i, j: (0, 0, j)),
            ],
            out_specs=pl.BlockSpec((tb, S, tf), lambda i, j: (i, 0, j)),
        ),
        compiler_params=pltpu.CompilerParams(
            dimension_semantics=("parallel", "parallel"),
            vmem_limit_bytes=vmem_limit,
        ),
    )(x, a3d, b3d)


def batchnorm_ref(x, a_2, b_2, eps=1e-6):
    x = x.astype(jnp.float32)
    mean = jnp.mean(x, axis=1, keepdims=True)
    std = jnp.std(x, axis=1, keepdims=True, ddof=1)   # unbiased, like torch
    return a_2 * (x - mean) / (std + eps) + b_2


if __name__ == "__main__":
    # Deterministic parameter init matching nn.Parameter(torch.ones/zeros(features)).
    key = jax.random.PRNGKey(0)

    # --- Test 1: f32, small shape (whole-array single-step grid path) ---
    B, S, F = 4, 16, 256
    x = jax.random.normal(key, (B, S, F), dtype=jnp.float32)
    a_2 = jnp.ones((F,), dtype=jnp.float32)
    b_2 = jnp.zeros((F,), dtype=jnp.float32)
    out = jax.block_until_ready(batchnorm_pallas(x, a_2, b_2, eps=1e-6))
    ref = batchnorm_ref(x, a_2, b_2, eps=1e-6)
    assert out.shape == (B, S, F)
    assert jnp.allclose(out, ref, atol=1e-5, rtol=1e-5), "f32 mismatch vs reference"

    # --- Test 2: bf16 I/O at a modest BERT-ish shape, exercising the 2-D
    #     (batch-block, feature-block) parallel grid and the F-tiling path ---
    B2, S2, F2 = 8, 64, 768
    x2 = jax.random.normal(jax.random.PRNGKey(0), (B2, S2, F2), dtype=jnp.float32)
    a2 = jnp.ones((F2,), dtype=jnp.float32)
    b2 = jnp.zeros((F2,), dtype=jnp.float32)
    out2 = jax.block_until_ready(
        batchnorm_pallas(x2.astype(jnp.bfloat16), a2, b2, eps=1e-6))
    ref2 = batchnorm_ref(x2.astype(jnp.bfloat16), a2, b2, eps=1e-6)
    assert out2.dtype == jnp.bfloat16
    assert jnp.allclose(out2.astype(jnp.float32), ref2, atol=5e-2, rtol=5e-2), \
        "bf16 mismatch vs reference"

    print("KERNEL_OK")
</pallas_src>

<mosaic_0001>
module attributes {stable_mosaic.version = 11 : i64} {
  func.func @kernel(%arg0: i32, %arg1: i32, %arg2: memref<4x16x256xf32, #tpu.memory_space<vmem>>, %arg3: memref<1x1x256xf32, #tpu.memory_space<vmem>>, %arg4: memref<1x1x256xf32, #tpu.memory_space<vmem>>, %arg5: memref<4x16x256xf32, #tpu.memory_space<vmem>>) attributes {dimension_semantics = [#tpu.dimension_semantics<parallel>, #tpu.dimension_semantics<parallel>], iteration_bounds = array<i64: 1, 1>, scalar_prefetch = 0 : i64, scratch_operands = 0 : i64, tpu.core_type = #tpu.core_type<tc>, window_params = [{transform_indices = @transform_0, window_bounds = array<i64: 4, 16, 256>}, {transform_indices = @transform_1, window_bounds = array<i64: 1, 1, 256>}, {transform_indices = @transform_2, window_bounds = array<i64: 1, 1, 256>}, {transform_indices = @transform_3, window_bounds = array<i64: 4, 16, 256>}]} {
    %c0 = arith.constant 0 : index
    %c0_0 = arith.constant 0 : index
    %c0_1 = arith.constant 0 : index
    %0 = vector.load %arg2[%c0, %c0_0, %c0_1] : memref<4x16x256xf32, #tpu.memory_space<vmem>>, vector<4x16x256xf32>
    %cst = arith.constant dense<0.000000e+00> : vector<4x256xf32>
    %1 = vector.multi_reduction <add>, %0, %cst [1] : vector<4x16x256xf32> to vector<4x256xf32>
    %2 = vector.shape_cast %1 : vector<4x256xf32> to vector<4x1x256xf32>
    %cst_2 = arith.constant 1.600000e+01 : f32
    %3 = vector.broadcast %cst_2 : f32 to vector<4x1x256xf32>
    %4 = arith.divf %2, %3 : vector<4x1x256xf32>
    %5 = vector.broadcast %4 : vector<4x1x256xf32> to vector<4x16x256xf32>
    %6 = arith.subf %0, %5 : vector<4x16x256xf32>
    %7 = arith.mulf %6, %6 : vector<4x16x256xf32>
    %cst_3 = arith.constant dense<0.000000e+00> : vector<4x256xf32>
    %8 = vector.multi_reduction <add>, %7, %cst_3 [1] : vector<4x16x256xf32> to vector<4x256xf32>
    %9 = vector.shape_cast %8 : vector<4x256xf32> to vector<4x1x256xf32>
    %cst_4 = arith.constant 0.0666666701 : f32
    %10 = vector.broadcast %cst_4 : f32 to vector<4x1x256xf32>
    %11 = arith.mulf %9, %10 : vector<4x1x256xf32>
    %12 = math.sqrt %11 : vector<4x1x256xf32>
    %cst_5 = arith.constant 9.99999997E-7 : f32
    %13 = vector.broadcast %cst_5 : f32 to vector<4x1x256xf32>
    %14 = arith.addf %12, %13 : vector<4x1x256xf32>
    %cst_6 = arith.constant 1.000000e+00 : f32
    %15 = vector.broadcast %cst_6 : f32 to vector<4x1x256xf32>
    %16 = arith.divf %15, %14 : vector<4x1x256xf32>
    %c0_7 = arith.constant 0 : index
    %c0_8 = arith.constant 0 : index
    %c0_9 = arith.constant 0 : index
    %17 = vector.load %arg3[%c0_7, %c0_8, %c0_9] : memref<1x1x256xf32, #tpu.memory_space<vmem>>, vector<1x1x256xf32>
    %c0_10 = arith.constant 0 : index
    %c0_11 = arith.constant 0 : index
    %c0_12 = arith.constant 0 : index
    %18 = vector.load %arg4[%c0_10, %c0_11, %c0_12] : memref<1x1x256xf32, #tpu.memory_space<vmem>>, vector<1x1x256xf32>
    %19 = vector.broadcast %17 : vector<1x1x256xf32> to vector<4x1x256xf32>
    %20 = arith.mulf %19, %16 : vector<4x1x256xf32>
    %21 = arith.mulf %20, %4 : vector<4x1x256xf32>
    %22 = vector.broadcast %18 : vector<1x1x256xf32> to vector<4x1x256xf32>
    %23 = arith.subf %22, %21 : vector<4x1x256xf32>
    %24 = vector.broadcast %20 : vector<4x1x256xf32> to vector<4x16x256xf32>
    %25 = arith.mulf %0, %24 : vector<4x16x256xf32>
    %26 = vector.broadcast %23 : vector<4x1x256xf32> to vector<4x16x256xf32>
    %27 = arith.addf %25, %26 : vector<4x16x256xf32>
    %c0_13 = arith.constant 0 : index
    %c0_14 = arith.constant 0 : index
    %c0_15 = arith.constant 0 : index
    %28 = vector.load %arg5[%c0_13, %c0_14, %c0_15] : memref<4x16x256xf32, #tpu.memory_space<vmem>>, vector<4x16x256xf32>
    tpu.vector_store %arg5[%c0_13, %c0_14, %c0_15], %27 {strides = array<i32>} : memref<4x16x256xf32, #tpu.memory_space<vmem>>, vector<4x16x256xf32>,
    return
  }
  func.func @transform_0(%arg0: i32, %arg1: i32) -> (i32, i32, i32) {
    %c0_i32 = arith.constant 0 : i32
    %c0_i32_0 = arith.constant 0 : i32
    return %arg0, %c0_i32, %arg1 : i32, i32, i32
  }
  func.func @transform_1(%arg0: i32, %arg1: i32) -> (i32, i32, i32) {
    %c0_i32 = arith.constant 0 : i32
    %c0_i32_0 = arith.constant 0 : i32
    %c0_i32_1 = arith.constant 0 : i32
    return %c0_i32, %c0_i32_0, %arg1 : i32, i32, i32
  }
  func.func @transform_2(%arg0: i32, %arg1: i32) -> (i32, i32, i32) {
    %c0_i32 = arith.constant 0 : i32
    %c0_i32_0 = arith.constant 0 : i32
    %c0_i32_1 = arith.constant 0 : i32
    return %c0_i32, %c0_i32_0, %arg1 : i32, i32, i32
  }
  func.func @transform_3(%arg0: i32, %arg1: i32) -> (i32, i32, i32) {
    %c0_i32 = arith.constant 0 : i32
    %c0_i32_0 = arith.constant 0 : i32
    return %arg0, %c0_i32, %arg1 : i32, i32, i32
  }
}

</mosaic_0001>

<bundles_post_ra>
// kernel: tpu_custom_call.1
= control target key start
LH: loop header
LB: loop body
LE: loop exit
PB: predicated region body
PF: predicated region fallthrough
CT: control target
= control target key end

     0   :  { %8 = vsyncpa [#allocation3], 0  ;;  %s985_s0 = inlined_call_operand.hbm [shape: f32[4,16,256], index: 0, kind: input, shape index: {}]   ;;  %s986_s1 = inlined_call_operand.vmem [shape: f32[1,1,256], index: 1, kind: input, shape index: {}]   ;;  %s987_s2 = inlined_call_operand.vmem [shape: f32[1,1,256], index: 2, kind: input, shape index: {}]   ;;  %s988_s3 = inlined_call_operand.hbm [shape: f32[4,16,256], index: 3, kind: output, shape index: {}]  }
   0x1   :  { %9 = vsyncpa [#allocation4], 0  ;;  %s682_s12 = smov [#allocation2]   ;;  %s634_s16 = scalar_lea.hbm %s985_s0, 2048 }
   0x2   :  { %s15_s13 = sshll.u32 %s682_s12, 4  ;;  %p635_p0 = scmp.ne.s32.totalorder %s985_s0, %s634_s16  ;;  %s16_s13 = int_to_ptr.vmem [resolvable:$true] %s15_s13 }
   0x3   :  { %p638_p1 = scmp.lt.u32.totalorder %s634_s16, %s985_s0 }
   0x5   :  { %p640_p2 = pnand %p638_p1, %p635_p0 }
   0x7   :  { %643 = shalt.err (!%p640_p2)
}
   0x8   :  { %s644_s21 = scalar_lea.vmem %s16_s13, 2048  ;;  %p649_p4 = scmp.lt.s32.totalorder %s16_s13, %s16_s13 }
   0x9   :  { %p645_p3 = scmp.ne.s32.totalorder %s16_s13, %s644_s21  ;;  %p650_p5 = scmp.lt.s32.totalorder %s644_s21, %s644_s21 }
   0xb   :  { %p651_p6 = por %p650_p5, %p649_p4 }
   0xd   :  { %p652_p7 = pnand %p651_p6, %p645_p3 }
   0xf   :  { %655 = shalt.err (!%p652_p7)
}
  0x10   :  { %s683_s22 = smov 256   ;;  %s684_s23 = smov 16  }
  0x11   :  { %21 = dma.hbm_to_vmem [thread:$0]  %s985_s0, 2048, %s16_s13, [#allocation3], %s683_s22, %s683_s22, %s684_s23  }
  0x12   :  { %678 = dma.done.wait [#allocation3], 2048  }
  0x13   :  { %679 = vsyncadd [#allocation3], 4294965248  ;;  %v722_v0 = vld [vmem:[#allocation2] sm:$0xff]  ;;  %v724_v1 = vld [vmem:[#allocation2 + $0x8] sm:$0xff] }
  0x14   :  { %v726_v2 = vld [vmem:[#allocation2 + $0x10] sm:$0xff]  ;;  %v728_v3 = vld [vmem:[#allocation2 + $0x18] sm:$0xff]  ;;  %v734_v6 = vld [vmem:[#allocation2 + $0x20] sm:$0xff] }
  0x15   :  { %v45_v4 = vadd.f32 %v726_v2, %v722_v0  ;;  %v52_v5 = vadd.f32 %v728_v3, %v724_v1  ;;  %v736_v7 = vld [vmem:[#allocation2 + $0x28] sm:$0xff]  ;;  %v738_v8 = vld [vmem:[#allocation2 + $0x30] sm:$0xff]  ;;  %v740_v10 = vld [vmem:[#allocation2 + $0x38] sm:$0xff] }
  0x16   :  { %v59_v11 = vadd.f32 %v738_v8, %v734_v6  ;;  %v744_v12 = vld [vmem:[#allocation2 + $0x40] sm:$0xff]  ;;  %v746_v13 = vld [vmem:[#allocation2 + $0x48] sm:$0xff]  ;;  %v66_v15 = vadd.f32 %v740_v10, %v736_v7  ;;  %v750_v16 = vld [vmem:[#allocation2 + $0x50] sm:$0xff] }
  0x17   :  { %v46_v9 = vrot.slane %v45_v4, 4  ;;  %v53_v14 = vrot.slane %v52_v5, 4  ;;  %v752_v17 = vld [vmem:[#allocation2 + $0x58] sm:$0xff]  ;;  %v754_v18 = vld [vmem:[#allocation2 + $0x60] sm:$0xff]  ;;  %v73_v21 = vadd.f32 %v750_v16, %v744_v12  ;;  %v760_v23 = vld [vmem:[#allocation2 + $0x68] sm:$0xff] }
  0x18   :  { %v60_v20 = vrot.slane %v59_v11, 4  ;;  %v80_v22 = vadd.f32 %v752_v17, %v746_v13  ;;  %v762_v24 = vld [vmem:[#allocation2 + $0x70] sm:$0xff]  ;;  %v764_v25 = vld [vmem:[#allocation2 + $0x78] sm:$0xff]  ;;  %v67_v27 = vrot.slane %v66_v15, 4 }
  0x19   :  { %v47_v19 = vadd.f32 %v46_v9, %v45_v4  ;;  %v54_v26 = vadd.f32 %v53_v14, %v52_v5  ;;  %v87_v28 = vadd.f32 %v762_v24, %v754_v18  ;;  %v94_v29 = vadd.f32 %v764_v25, %v760_v23 }
  0x1a   :  { %v61_v31 = vadd.f32 %v60_v20, %v59_v11  ;;  %v74_v32 = vrot.slane %v73_v21, 4  ;;  %v81_v33 = vrot.slane %v80_v22, 4  ;;  %v68_v35 = vadd.f32 %v67_v27, %v66_v15 }
  0x1b   :  { %v48_v30 = vrot.slane %v47_v19, 2  ;;  %v55_v34 = vrot.slane %v54_v26, 2  ;;  %v88_v36 = vrot.slane %v87_v28, 4  ;;  %v95_v37 = vrot.slane %v94_v29, 4 }
  0x1c   :  { %v62_v39 = vrot.slane %v61_v31, 2  ;;  %v75_v40 = vadd.f32 %v74_v32, %v73_v21  ;;  %v82_v41 = vadd.f32 %v81_v33, %v80_v22  ;;  %v69_v43 = vrot.slane %v68_v35, 2 }
  0x1d   :  { %v49_v38 = vadd.f32 %v48_v30, %v47_v19  ;;  %v56_v42 = vadd.f32 %v55_v34, %v54_v26  ;;  %v89_v44 = vadd.f32 %v88_v36, %v87_v28  ;;  %v96_v51 = vadd.f32 %v95_v37, %v94_v29 }
  0x1e   :  { %v63_v46 = vadd.f32 %v62_v39, %v61_v31  ;;  %v76_v47 = vrot.slane %v75_v40, 2  ;;  %v83_v48 = vrot.slane %v82_v41, 2  ;;  %v70_v50 = vadd.f32 %v69_v43, %v68_v35 }
  0x1f   :  { %v50_v45 = vrot.slane %v49_v38, 1  ;;  %v57_v49 = vrot.slane %v56_v42, 1  ;;  %v90_v55 = vrot.slane %v89_v44, 2  ;;  %v97_v4 = vrot.slane %v96_v51, 2 }
  0x20   :  { %v64_v53 = vrot.slane %v63_v46, 1  ;;  %v77_v54 = vadd.f32 %v76_v47, %v75_v40  ;;  %v71_v57 = vrot.slane %v70_v50, 1  ;;  %v84_v58 = vadd.f32 %v83_v48, %v82_v41 }
  0x21   :  { %v51_v52 = vadd.f32 %v50_v45, %v49_v38  ;;  %v58_v56 = vadd.f32 %v57_v49, %v56_v42  ;;  %v91_v14 = vadd.f32 %v90_v55, %v89_v44  ;;  %v98_v39 = vadd.f32 %v97_v4, %v96_v51 }
  0x22   :  { %v65_v60 = vadd.f32 %v64_v53, %v63_v46  ;;  %v72_v62 = vadd.f32 %v71_v57, %v70_v50  ;;  %v78_v63 = vrot.slane %v77_v54, 1  ;;  %v85_v21 = vrot.slane %v84_v58, 1 }
  0x23   :  { %v770_v59 = vmul.f32 0.0625, %v51_v52  ;;  %v772_v61 = vmul.f32 0.0625, %v58_v56  ;;  %v92_v46 = vrot.slane %v91_v14, 1 }
  0x24   :  { %v778_v11 = vmul.f32 0.0625, %v65_v60  ;;  %v784_v20 = vmul.f32 0.0625, %v72_v62  ;;  %v79_v32 = vadd.f32 %v78_v63, %v77_v54  ;;  %v86_v43 = vadd.f32 %v85_v21, %v84_v58 }
  0x25   :  { %v110_v5 = vsub.f32 %v722_v0, %v770_v59  ;;  %v112_v9 = vsub.f32 %v726_v2, %v770_v59  ;;  %v111_v15 = vsub.f32 %v724_v1, %v772_v61  ;;  %v113_v19 = vsub.f32 %v728_v3, %v772_v61 }
  0x26   :  { %v114_v27 = vsub.f32 %v734_v6, %v778_v11  ;;  %v116_v28 = vsub.f32 %v738_v8, %v778_v11  ;;  %v115_v31 = vsub.f32 %v736_v7, %v784_v20  ;;  %v117_v34 = vsub.f32 %v740_v10, %v784_v20 }
  0x27   :  { %v126_v22 = vmul.f32 %v110_v5, %v110_v5  ;;  %v128_v26 = vmul.f32 %v112_v9, %v112_v9  ;;  %v127_v29 = vmul.f32 %v111_v15, %v111_v15  ;;  %v129_v30 = vmul.f32 %v113_v19, %v113_v19 }
  0x28   :  { %v130_v35 = vmul.f32 %v114_v27, %v114_v27  ;;  %v132_v36 = vmul.f32 %v116_v28, %v116_v28  ;;  %v131_v38 = vmul.f32 %v115_v31, %v115_v31  ;;  %v133_v41 = vmul.f32 %v117_v34, %v117_v34 }
  0x29   :  { %v142_v33 = vadd.f32 %v128_v26, %v126_v22  ;;  %v149_v37 = vadd.f32 %v129_v30, %v127_v29  ;;  %v794_v45 = vmul.f32 0.0625, %v79_v32  ;;  %v796_v50 = vmul.f32 0.0625, %v86_v43 }
  0x2a   :  { %v156_v42 = vadd.f32 %v132_v36, %v130_v35  ;;  %v163_v49 = vadd.f32 %v133_v41, %v131_v38  ;;  %v99_v54 = vrot.slane %v98_v39, 1  ;;  %v93_v27 = vadd.f32 %v92_v46, %v91_v14 }
  0x2b   :  { %v143_v40 = vrot.slane %v142_v33, 4  ;;  %v150_v44 = vrot.slane %v149_v37, 4  ;;  %v118_v53 = vsub.f32 %v744_v12, %v794_v45  ;;  %v120_v51 = vsub.f32 %v750_v16, %v794_v45 }
  0x2c   :  { %v157_v48 = vrot.slane %v156_v42, 4  ;;  %v164_v57 = vrot.slane %v163_v49, 4  ;;  %v119_v58 = vsub.f32 %v746_v13, %v796_v50  ;;  %v121_v62 = vsub.f32 %v752_v17, %v796_v50 }
  0x2d   :  { %v144_v47 = vadd.f32 %v143_v40, %v142_v33  ;;  %v151_v52 = vadd.f32 %v150_v44, %v149_v37  ;;  %v134_v63 = vmul.f32 %v118_v53, %v118_v53  ;;  %v136_v4 = vmul.f32 %v120_v51, %v120_v51 }
  0x2e   :  { %v158_v56 = vadd.f32 %v157_v48, %v156_v42  ;;  %v165_v15 = vadd.f32 %v164_v57, %v163_v49  ;;  %v135_v19 = vmul.f32 %v119_v58, %v119_v58  ;;  %v137_v22 = vmul.f32 %v121_v62, %v121_v62 }
  0x2f   :  { %v145_v55 = vrot.slane %v144_v47, 2  ;;  %v152_v60 = vrot.slane %v151_v52, 2  ;;  %v170_v26 = vadd.f32 %v136_v4, %v134_v63  ;;  %v100_v34 = vadd.f32 %v99_v54, %v98_v39 }
  0x30   :  { %v159_v9 = vrot.slane %v158_v56, 2  ;;  %v166_v30 = vrot.slane %v165_v15, 2  ;;  %v177_v33 = vadd.f32 %v137_v22, %v135_v19  ;;  %v806_v42 = vmul.f32 0.0625, %v93_v27 }
  0x31   :  { %v146_v5 = vadd.f32 %v145_v55, %v144_v47  ;;  %v153_v21 = vadd.f32 %v152_v60, %v151_v52  ;;  %v171_v32 = vrot.slane %v170_v26, 4  ;;  %v808_v49 = vmul.f32 0.0625, %v100_v34 }
  0x32   :  { %v160_v29 = vadd.f32 %v159_v9, %v158_v56  ;;  %v167_v37 = vadd.f32 %v166_v30, %v165_v15  ;;  %v178_v41 = vrot.slane %v177_v33, 4  ;;  %v122_v39 = vsub.f32 %v754_v18, %v806_v42 }
  0x33   :  { %v147_v28 = vrot.slane %v146_v5, 1  ;;  %v154_v31 = vrot.slane %v153_v21, 1  ;;  %v172_v40 = vadd.f32 %v171_v32, %v170_v26  ;;  %v123_v55 = vsub.f32 %v760_v23, %v808_v49 }
  0x34   :  { %v161_v36 = vrot.slane %v160_v29, 1  ;;  %v168_v47 = vrot.slane %v167_v37, 1  ;;  %v179_v46 = vadd.f32 %v178_v41, %v177_v33  ;;  %v124_v56 = vsub.f32 %v762_v24, %v806_v42 }
  0x35   :  { %v148_v35 = vadd.f32 %v147_v28, %v146_v5  ;;  %v155_v38 = vadd.f32 %v154_v31, %v153_v21  ;;  %v173_v14 = vrot.slane %v172_v40, 2  ;;  %v125_v57 = vsub.f32 %v764_v25, %v808_v49 }
  0x36   :  { %v162_v44 = vadd.f32 %v161_v36, %v160_v29  ;;  %v169_v52 = vadd.f32 %v168_v47, %v167_v37  ;;  %v180_v54 = vrot.slane %v179_v46, 2  ;;  %v138_v63 = vmul.f32 %v122_v39, %v122_v39 }
  0x37   :  { %v198_v43 = vmul.f32 0.06666667, %v148_v35  ;;  %v199_v48 = vmul.f32 0.06666667, %v155_v38  ;;  %v174_v51 = vadd.f32 %v173_v14, %v172_v40  ;;  %v139_v4 = vmul.f32 %v123_v55, %v123_v55 }
  0x38   :  { %v812_v53 = vmul.f32 0.06666667, %v162_v44  ;;  %v820_v58 = vmul.f32 0.06666667, %v169_v52  ;;  %v181_v62 = vadd.f32 %v180_v54, %v179_v46  ;;  %v140_v15 = vmul.f32 %v124_v56, %v124_v56 }
  0x39   :  { %602 = vrsqrt.f32 %v198_v43  ;;  %v175_v60 = vrot.slane %v174_v51, 1  ;;  %v141_v19 = vmul.f32 %v125_v57, %v125_v57  ;;  %v300_v21 = vlaneseq }
  0x3a   :  { %604 = vrsqrt.f32 %v199_v48  ;;  %v182_v9 = vrot.slane %v181_v62, 1  ;;  %vm208_vm0 = vcmp.eq.f32.partialorder %v198_v43, inf  ;;  %v184_v27 = vadd.f32 %v140_v15, %v138_v63 }
  0x3b   :  { %606 = vrsqrt.f32 %v812_v53  ;;  %v176_v5 = vadd.f32 %v175_v60, %v174_v51  ;;  %vm210_vm1 = vcmp.eq.f32.partialorder %v198_v43, 0.0  ;;  %v211_v29 = vand.u32 2147483648, %v198_v43 }
  0x3c   :  { %608 = vrsqrt.f32 %v820_v58  ;;  %v183_v22 = vadd.f32 %v182_v9, %v181_v62  ;;  %vm215_vm2 = vcmp.eq.f32.partialorder %v199_v48, inf  ;;  %v218_v30 = vand.u32 2147483648, %v199_v48 }
  0x3d   :  { %v824_v26 = vmul.f32 0.06666667, %v176_v5  ;;  %v191_v34 = vadd.f32 %v141_v19, %v139_v4  ;;  %vm217_vm3 = vcmp.eq.f32.partialorder %v199_v48, 0.0  ;;  %vm222_vm4 = vcmp.eq.f32.partialorder %v812_v53, inf }
  0x3e   :  { %v826_v33 = vmul.f32 0.06666667, %v183_v22  ;;  %v185_v36 = vrot.slane %v184_v27, 4  ;;  %vm224_vm5 = vcmp.eq.f32.partialorder %v812_v53, 0.0  ;;  %v225_v38 = vand.u32 2147483648, %v812_v53 }
  0x3f   :  { %610 = vrsqrt.f32 %v824_v26  ;;  %vm229_vm6 = vcmp.eq.f32.partialorder %v820_v58, inf  ;;  %v192_v52 = vrot.slane %v191_v34, 4  ;;  %vm231_vm7 = vcmp.eq.f32.partialorder %v820_v58, 0.0 }
  0x40   :  { %612 = vrsqrt.f32 %v826_v33  ;;  %v186_v47 = vadd.f32 %v185_v36, %v184_v27  ;;  %v232_v55 = vand.u32 2147483648, %v820_v58  ;;  %v685_v60 = vmov 1966171168  }
  0x41   :  { %v193_v57 = vadd.f32 %v192_v52, %v191_v34  ;;  %v298_v62 = vunpack.c.l.s4 %v685_v60  ;;  %v301_v19 = vshrl.u32 %v300_v21, 7  ;;  %vm236_vm8 = vcmp.eq.f32.partialorder %v824_v26, inf }
  0x42   :  { %v187_v56 = vrot.slane %v186_v47, 2  ;;  %vm238_vm9 = vcmp.eq.f32.partialorder %v824_v26, 0.0  ;;  %vm243_vm10 = vcmp.eq.f32.partialorder %v826_v33, inf  ;;  %vm245_vm11 = vcmp.eq.f32.partialorder %v826_v33, 0.0 }
  0x43   :  { %v603_v28 = vpop.eup %602  ;;  %v194_v15 = vrot.slane %v193_v57, 2 }
  0x44   :  { %v605_v31 = vpop.eup %604  ;;  %v207_v32 = vmul.f32 %v603_v28, %v198_v43  ;;  %v188_v4 = vadd.f32 %v187_v56, %v186_v47 }
  0x45   :  { %v214_v35 = vmul.f32 %v605_v31, %v199_v48  ;;  %v607_v40 = vpop.eup %606  ;;  %v299_v31 = vunpack.c.0.s8 %v298_v62  ;;  %v887_v62 = vsub.s32 0, %v301_v19 }
  0x46   :  { %v209_v37 = vsel %vm208_vm0, %v198_v43, %v207_v32  ;;  %v221_v39 = vmul.f32 %v607_v40, %v812_v53  ;;  %v609_v51 = vpop.eup %608  ;;  %v189_v27 = vrot.slane %v188_v4, 1  ;;  %v372_v40 = vcombine.low %v770_v59, %v772_v61 }
  0x47   :  { %v212_v41 = vsel %vm210_vm1, %v211_v29, %v209_v37  ;;  %v216_v44 = vsel %vm215_vm2, %v199_v48, %v214_v35  ;;  %v228_v48 = vmul.f32 %v609_v51, %v820_v58 }
  0x48   :  { %v219_v14 = vsel %vm217_vm3, %v218_v30, %v216_v44  ;;  %v262_v46 = vadd.f32 1e-06, %v212_v41  ;;  %v223_v43 = vsel %vm222_vm4, %v812_v53, %v221_v39  ;;  %v239_v53 = vand.u32 2147483648, %v824_v26 }
  0x49   :  { %v263_v54 = vadd.f32 1e-06, %v219_v14  ;;  %v226_v63 = vsel %vm224_vm5, %v225_v38, %v223_v43  ;;  %v230_v5 = vsel %vm229_vm6, %v820_v58, %v228_v48  ;;  %v611_v28 = vpop.eup %610  ;;  %v195_v30 = vadd.f32 %v194_v15, %v193_v57  ;;  %v899_v15 = vld [vmem:[%s987_s2] sm:$0x3]  ;;  %s686_s2 = smov [#allocation5]  }
  0x4a   :  { %614 = vrcp.f32 %v262_v46  ;;  %v264_v9 = vadd.f32 1e-06, %v226_v63  ;;  %v233_v22 = vsel %vm231_vm7, %v232_v55, %v230_v5  ;;  %v235_v32 = vmul.f32 %v611_v28, %v824_v26  ;;  %v613_v35 = vpop.eup %612  ;;  %s585_s28 = sshll.u32 %s686_s2, 4  ;;  %s586_s28 = int_to_ptr.vmem [resolvable:$true] %s585_s28 }
  0x4b   :  { %616 = vrcp.f32 %v263_v54  ;;  %v265_v29 = vadd.f32 1e-06, %v233_v22  ;;  %v190_v34 = vadd.f32 %v189_v27, %v188_v4  ;;  %v246_v58 = vand.u32 2147483648, %v826_v33  ;;  %s656_s29 = scalar_lea.vmem %s586_s28, 2048  ;;  %p661_p9 = scmp.lt.s32.totalorder %s586_s28, %s586_s28 }
  0x4c   :  { %618 = vrcp.f32 %v264_v9  ;;  %v196_v21 = vrot.slane %v195_v30, 1  ;;  %v237_v36 = vsel %vm236_vm8, %v824_v26, %v235_v32  ;;  %v242_v37 = vmul.f32 %v613_v35, %v826_v33  ;;  %p657_p8 = scmp.ne.s32.totalorder %s586_s28, %s656_s29  ;;  %p662_p10 = scmp.lt.s32.totalorder %s656_s29, %s656_s29 }
  0x4d   :  { %620 = vrcp.f32 %v265_v29  ;;  %v862_v38 = vmul.f32 0.06666667, %v190_v34  ;;  %v240_v41 = vsel %vm238_vm9, %v239_v53, %v237_v36  ;;  %v868_v39 = vsub.s32 %v299_v31, %v301_v19 }
  0x4e   :  { %v197_v44 = vadd.f32 %v196_v21, %v195_v30  ;;  %v244_v47 = vsel %vm243_vm10, %v826_v33, %v242_v37  ;;  %v266_v14 = vadd.f32 1e-06, %v240_v41  ;;  %v387_v26 = vcombine.low %v778_v11, %v784_v20  ;;  %v883_v20 = vld [vmem:[%s986_s1] sm:$0x3]  ;;  %p663_p11 = por %p662_p10, %p661_p9 }
  0x4f   :  { %622 = vrsqrt.f32 %v862_v38  ;;  %v247_v52 = vsel %vm245_vm11, %v246_v58, %v244_v47  ;;  %v379_v61 = vrot.slane %v372_v40, %v868_v39  ;;  %v402_v11 = vcombine.low %v794_v45, %v796_v50 }
  0x50   :  { %v872_v51 = vmul.f32 0.06666667, %v197_v44  ;;  %v267_v55 = vadd.f32 1e-06, %v247_v52  ;;  %624 = vrcp.f32 %v266_v14  ;;  %v394_v43 = vrot.slane %v387_v26, %v868_v39  ;;  %p664_p12 = pnand %p663_p11, %p657_p8 }
  0x51   :  { %v386_v60 = vrot.slane %v379_v61, %v868_v39  ;;  %v889_v63 = vsub.s32 1, %v301_v19  ;;  %v894_v45 = vrot.slane %v402_v11, %v868_v39  ;;  %vm250_vm12 = vcmp.eq.f32.partialorder %v862_v38, inf }
  0x52   :  { %626 = vrsqrt.f32 %v872_v51  ;;  %v401_v9 = vrot.slane %v394_v43, %v868_v39  ;;  %vm252_vm13 = vcmp.eq.f32.partialorder %v862_v38, 0.0  ;;  %v253_v19 = vand.u32 2147483648, %v862_v38 }
  0x53   :  { %628 = vrcp.f32 %v267_v55  ;;  %vm257_vm14 = vcmp.eq.f32.partialorder %v872_v51, inf  ;;  %vm259_vm15 = vcmp.eq.f32.partialorder %v872_v51, 0.0  ;;  %v260_v32 = vand.u32 2147483648, %v872_v51 }
  0x54   :  { %v615_v46 = vpop.eup %614 }
  0x55   :  { %v617_v54 = vpop.eup %616 }
  0x56   :  { %v296_v59 = vcombine.low %v615_v46, %v617_v54  ;;  %v619_v33 = vpop.eup %618 }
  0x57   :  { %v621_v48 = vpop.eup %620 }
  0x58   :  { %v303_v56 = vrot.slane %v296_v59, %v868_v39  ;;  %v311_v4 = vcombine.low %v619_v33, %v621_v48 }
  0x59   :  { %v623_v50 = vpop.eup %622 }
  0x5a   :  { %v310_v57 = vrot.slane %v303_v56, %v868_v39  ;;  %v318_v22 = vrot.slane %v311_v4, %v868_v39  ;;  %v249_v53 = vmul.f32 %v623_v50, %v862_v38  ;;  %v625_v30 = vpop.eup %624 }
  0x5c   :  { %v360_v5 = vmul.f32 %v310_v57, %v883_v20  ;;  %v325_v31 = vrot.slane %v318_v22, %v868_v39  ;;  %v627_v34 = vpop.eup %626  ;;  %v251_v44 = vsel %vm250_vm12, %v862_v38, %v249_v53 }
  0x5d   :  { %v629_v37 = vpop.eup %628  ;;  %v256_v47 = vmul.f32 %v627_v34, %v872_v51 }
  0x5e   :  { %v436_v27 = vmul.f32 %v386_v60, %v360_v5  ;;  %v451_v28 = vrot.slane %v360_v5, %v887_v62  ;;  %v455_v29 = vrot.slane %v360_v5, %v889_v63  ;;  %v361_v41 = vmul.f32 %v325_v31, %v883_v20 }
  0x5f   :  { %v258_v52 = vsel %vm257_vm14, %v872_v51, %v256_v47 }
  0x60   :  { %v440_v35 = vsub.f32 %v899_v15, %v436_v27  ;;  %v488_v58 = vmul.f32 %v451_v28, %v722_v0  ;;  %v489_v21 = vmul.f32 %v455_v29, %v724_v1  ;;  %v490_v36 = vmul.f32 %v451_v28, %v726_v2 }
  0x61   :  { %v491_v40 = vmul.f32 %v455_v29, %v728_v3  ;;  %v326_v0 = vcombine.low %v625_v30, %v629_v37  ;;  %v254_v1 = vsel %vm252_vm13, %v253_v19, %v251_v44  ;;  %v437_v2 = vmul.f32 %v401_v9, %v361_v41 }
  0x62   :  { %v511_v14 = vrot.slane %v440_v35, %v887_v62  ;;  %v515_v46 = vrot.slane %v440_v35, %v889_v63  ;;  %v459_v26 = vrot.slane %v361_v41, %v887_v62  ;;  %v463_v3 = vrot.slane %v361_v41, %v889_v63 }
  0x63   :  { %v441_v33 = vsub.f32 %v899_v15, %v437_v2  ;;  %v333_v48 = vrot.slane %v326_v0, %v868_v39  ;;  %v261_v57 = vsel %vm259_vm15, %v260_v32, %v258_v52  ;;  %v268_v60 = vadd.f32 1e-06, %v254_v1 }
  0x64   :  { %v548_v54 = vadd.f32 %v511_v14, %v488_v58  ;;  %v549_v55 = vadd.f32 %v515_v46, %v489_v21  ;;  %v550_v59 = vadd.f32 %v511_v14, %v490_v36  ;;  %v551_v61 = vadd.f32 %v515_v46, %v491_v40 }
  0x65   :  { %v492_v56 = vmul.f32 %v459_v26, %v734_v6  ;;  %v493_v38 = vmul.f32 %v463_v3, %v736_v7  ;;  %v494_v43 = vmul.f32 %v459_v26, %v738_v8  ;;  %v495_v11 = vmul.f32 %v463_v3, %v740_v10 }
  0x66   :  { %564 = vst [vmem:[#allocation5] sm:$0xff] %v548_v54  ;;  %565 = vst [vmem:[#allocation5 + $0x8] sm:$0xff] %v549_v55  ;;  %v519_v4 = vrot.slane %v441_v33, %v887_v62  ;;  %v523_v6 = vrot.slane %v441_v33, %v889_v63  ;;  %v269_v5 = vadd.f32 1e-06, %v261_v57  ;;  %v340_v7 = vrot.slane %v333_v48, %v868_v39 }
  0x67   :  { %566 = vst [vmem:[#allocation5 + $0x10] sm:$0xff] %v550_v59  ;;  %567 = vst [vmem:[#allocation5 + $0x18] sm:$0xff] %v551_v61  ;;  %v416_v8 = vrot.slane %v894_v45, %v868_v39  ;;  %630 = vrcp.f32 %v268_v60  ;;  %v417_v35 = vcombine.low %v806_v42, %v808_v49 }
  0x68   :  { %v552_v9 = vadd.f32 %v519_v4, %v492_v56  ;;  %v553_v50 = vadd.f32 %v523_v6, %v493_v38  ;;  %v554_v10 = vadd.f32 %v519_v4, %v494_v43  ;;  %v555_v22 = vadd.f32 %v523_v6, %v495_v11 }
  0x69   :  { %v362_v19 = vmul.f32 %v340_v7, %v883_v20  ;;  %632 = vrcp.f32 %v269_v5 }
  0x6a   :  { %568 = vst [vmem:[#allocation5 + $0x20] sm:$0xff] %v552_v9  ;;  %569 = vst [vmem:[#allocation5 + $0x28] sm:$0xff] %v553_v50 }
  0x6b   :  { %570 = vst [vmem:[#allocation5 + $0x30] sm:$0xff] %v554_v10  ;;  %571 = vst [vmem:[#allocation5 + $0x38] sm:$0xff] %v555_v22  ;;  %v438_v51 = vmul.f32 %v416_v8, %v362_v19  ;;  %v467_v27 = vrot.slane %v362_v19, %v887_v62  ;;  %v471_v28 = vrot.slane %v362_v19, %v889_v63 }
  0x6d   :  { %v442_v29 = vsub.f32 %v899_v15, %v438_v51  ;;  %v496_v45 = vmul.f32 %v467_v27, %v744_v12  ;;  %v497_v53 = vmul.f32 %v471_v28, %v746_v13  ;;  %v498_v30 = vmul.f32 %v467_v27, %v750_v16 }
  0x6e   :  { %v499_v31 = vmul.f32 %v471_v28, %v752_v17  ;;  %v424_v13 = vrot.slane %v417_v35, %v868_v39 }
  0x6f   :  { %v527_v32 = vrot.slane %v442_v29, %v887_v62  ;;  %v531_v34 = vrot.slane %v442_v29, %v889_v63 }
  0x70   :  { %v431_v44 = vrot.slane %v424_v13, %v868_v39 }
  0x71   :  { %v631_v58 = vpop.eup %630  ;;  %v556_v21 = vadd.f32 %v527_v32, %v496_v45  ;;  %v557_v36 = vadd.f32 %v531_v34, %v497_v53  ;;  %v558_v37 = vadd.f32 %v527_v32, %v498_v30  ;;  %v559_v40 = vadd.f32 %v531_v34, %v499_v31 }
  0x73   :  { %v633_v41 = vpop.eup %632  ;;  %572 = vst [vmem:[#allocation5 + $0x40] sm:$0xff] %v556_v21  ;;  %573 = vst [vmem:[#allocation5 + $0x48] sm:$0xff] %v557_v36 }
  0x74   :  { %574 = vst [vmem:[#allocation5 + $0x50] sm:$0xff] %v558_v37  ;;  %575 = vst [vmem:[#allocation5 + $0x58] sm:$0xff] %v559_v40  ;;  %v341_v12 = vcombine.low %v631_v58, %v633_v41 }
  0x76   :  { %v348_v16 = vrot.slane %v341_v12, %v868_v39 }
  0x78   :  { %v355_v17 = vrot.slane %v348_v16, %v868_v39 }
  0x7a   :  { %v363_v42 = vmul.f32 %v355_v17, %v883_v20 }
  0x7c   :  { %v439_v49 = vmul.f32 %v431_v44, %v363_v42  ;;  %v475_v47 = vrot.slane %v363_v42, %v887_v62  ;;  %v479_v14 = vrot.slane %v363_v42, %v889_v63 }
  0x7e   :  { %v443_v46 = vsub.f32 %v899_v15, %v439_v49  ;;  %v500_v0 = vmul.f32 %v475_v47, %v754_v18  ;;  %v501_v1 = vmul.f32 %v479_v14, %v760_v23  ;;  %v502_v2 = vmul.f32 %v475_v47, %v762_v24 }
  0x7f   :  { %v503_v26 = vmul.f32 %v479_v14, %v764_v25 }
  0x80   :  { %v535_v39 = vrot.slane %v443_v46, %v887_v62  ;;  %v539_v20 = vrot.slane %v443_v46, %v889_v63 }
  0x82   :  { %v560_v3 = vadd.f32 %v535_v39, %v500_v0  ;;  %v561_v52 = vadd.f32 %v539_v20, %v501_v1  ;;  %v562_v54 = vadd.f32 %v535_v39, %v502_v2  ;;  %v563_v55 = vadd.f32 %v539_v20, %v503_v26 }
  0x84   :  { %576 = vst [vmem:[#allocation5 + $0x60] sm:$0xff] %v560_v3  ;;  %577 = vst [vmem:[#allocation5 + $0x68] sm:$0xff] %v561_v52 }
  0x85   :  { %578 = vst [vmem:[#allocation5 + $0x70] sm:$0xff] %v562_v54  ;;  %579 = vst [vmem:[#allocation5 + $0x78] sm:$0xff] %v563_v55 }
  0x86   :  { %667 = shalt.err (!%p664_p12)
}
  0x87   :  { %s668_s5 = scalar_lea.hbm %s988_s3, 2048 }
  0x88   :  { %p669_p13 = scmp.ne.s32.totalorder %s988_s3, %s668_s5  ;;  %p672_p0 = scmp.lt.u32.totalorder %s668_s5, %s988_s3 }
  0x8a   :  { %p674_p1 = pnand %p672_p0, %p669_p13 }
  0x8c   :  { %677 = shalt.err (!%p674_p1)
}
  0x8d   :  { %591 = dma.vmem_to_hbm [thread:$0]  %s586_s28, 2048, %s988_s3, [#allocation4], %s683_s22, %s683_s22, %s684_s23  }
  0x8e   :  { %680 = dma.done.wait [#allocation4], 2048  }
  0x8f   :  { %681 = vsyncadd [#allocation4], 4294965248 }
  0x90   :  { %595 = vsyncpa [#allocation3], 1 }
  0x91   :  { %596 = vsyncpa [#allocation4], 1 }

</bundles_post_ra>
